<compile_context>
chip_gen: v6e
topology: v6e:2x2x1
jax: 0.10.0
libtpu: 0.0.40
codegen_flags: <defaults>
</compile_context>

<pallas_src>
import jax
import jax.numpy as jnp
from jax.experimental import pallas as pl
from jax.experimental.pallas import tpu as pltpu

# FocalLoss hyper-parameters (deterministic, set in-script).
ALPHA = 0.5          # float alpha -> weights = where(target > 0, 1-alpha, alpha)
GAMMA = 2.0          # focusing parameter (gamma==2 lowered to an explicit square)
IGNORE_INDEX = -100  # rows with this target are dropped from the mean
# reduction = 'mean' (alpha is a float, so mean == sum(tmp_loss)/num_valid)


def _make_focal_kernel(tile_n, n_rows):
    """Builds the per-block kernel; tile_n / n_rows are baked in as Python ints."""

    def kernel(logits_ref, target_ref, out_ref):
        x = logits_ref[...].astype(jnp.float32)        # (TN, C) f32
        tgt = target_ref[...]                          # (TN, 1) int32

        # Global row index: tail-block rows >= n_rows hold unspecified data
        # (the logits are NOT padded) and must contribute nothing.
        row = (pl.program_id(0) * tile_n
               + jax.lax.broadcasted_iota(jnp.int32, (tile_n, 1), 0))
        valid = jnp.logical_and(row < n_rows, tgt != IGNORE_INDEX)   # (TN,1) bool

        # Numerically stable log-sum-exp along classes (lane axis), all in f32.
        m = jnp.max(x, axis=-1, keepdims=True)                       # (TN, 1)
        e = jnp.exp(x - m)                                           # (TN, C)
        lse = jnp.log(jnp.sum(e, axis=-1, keepdims=True))            # (TN, 1)

        # gather(1, target) via a lane select on the RAW logits (no one-hot
        # convert+multiply); subtract m and lse on the (TN,1) result so the
        # full (TN, C) log-softmax tile is never materialized.
        col = jax.lax.broadcasted_iota(jnp.int32, x.shape, 1)
        zt = jnp.sum(jnp.where(col == tgt, x, 0.0), axis=-1, keepdims=True)
        logpt = (zt - m) - lse                                        # (TN, 1)
        pt = jnp.exp(logpt)                                           # (TN, 1)

        # gamma == 2.0: explicit square stays on the VPU (no pow on the EUP).
        u = 1.0 - pt
        if float(GAMMA) == 2.0:
            focal = -(u * u) * logpt
        else:
            focal = -(u ** GAMMA) * logpt

        # float-alpha weighting: target==0 gets alpha, positives get 1-alpha.
        weights = jnp.where(tgt > 0, 1.0 - ALPHA, ALPHA).astype(jnp.float32)

        # where-mask (not multiply) so NaN/Inf from garbage tail rows or
        # ignored rows can never leak into the partials.
        tmp = jnp.where(valid, focal * weights, 0.0)                  # (TN, 1)
        valid_f = valid.astype(jnp.float32)

        # Single merged (1,1,2) partial: lane 0 = loss sum, lane 1 = count.
        block_sum = jnp.sum(tmp)
        block_cnt = jnp.sum(valid_f)
        lane = jax.lax.broadcasted_iota(jnp.int32, (1, 1, 2), 2)
        out_ref[...] = jnp.where(lane == 0, block_sum, block_cnt).astype(jnp.float32)

    return kernel


def focal_loss(logits, targets, *,
               max_tile_bytes=2 * 1024 * 1024,   # logits bytes per block (pre-f32 cast)
               max_tile_rows=8192,
               min_blocks=4):
    """logits: (N, C) float; targets: (N,) int. Returns scalar mean focal loss."""
    N, C = logits.shape
    itemsize = jnp.dtype(logits.dtype).itemsize
    pack = 16 if itemsize == 2 else 8            # bf16 min sublane tile is 16

    # Largest row tile that (a) keeps the double-buffered logits tile + f32
    # temps comfortably inside VMEM on every generation (incl. v7x's 64 MiB),
    # (b) leaves >= min_blocks grid steps for megacore sharding / pipelining,
    # and (c) does not exceed the (rounded-up) problem size.
    row_bytes = C * itemsize
    tile_n = min(max_tile_rows, max(pack, max_tile_bytes // row_bytes))
    tile_n = max(pack, (tile_n // pack) * pack)
    per_block = pl.cdiv(pl.cdiv(N, min_blocks), pack) * pack
    tile_n = min(tile_n, max(pack, per_block))
    tile_n = min(tile_n, pl.cdiv(N, pack) * pack)

    num_blocks = pl.cdiv(N, tile_n)

    # Targets as (N, 1) int32; no padding of either input — the ragged tail
    # block is masked inside the kernel via the global row index.
    tgt2d = targets.astype(jnp.int32).reshape(N, 1)

    parts = pl.pallas_call(
        _make_focal_kernel(tile_n, N),
        out_shape=jax.ShapeDtypeStruct((num_blocks, 1, 2), jnp.float32),
        grid_spec=pltpu.PrefetchScalarGridSpec(
            num_scalar_prefetch=0,
            grid=(num_blocks,),
            in_specs=[
                pl.BlockSpec((tile_n, C), lambda i: (i, 0)),
                pl.BlockSpec((tile_n, 1), lambda i: (i, 0)),
            ],
            out_specs=pl.BlockSpec((1, 1, 2), lambda i: (i, 0, 0)),
        ),
        compiler_params=pltpu.CompilerParams(
            # Blocks are independent -> lets v7x shard them across its two TCs.
            dimension_semantics=("parallel",),
            vmem_limit_bytes=48 * 1024 * 1024,
        ),
    )(logits, tgt2d)

    # reduction == 'mean' with float alpha: torch.mean over the kept rows.
    # NOTE: if every row is ignored this is 0/0 -> NaN, matching torch.mean
    # over an empty tensor.
    total = jnp.sum(parts[:, 0, 0])
    count = jnp.sum(parts[:, 0, 1])
    return total / count


def focal_loss_ref(logits, targets):
    """Pure-JAX reference mirroring the PyTorch forward (float alpha, mean)."""
    valid = targets != IGNORE_INDEX
    logp = jax.nn.log_softmax(logits.astype(jnp.float32), axis=1)
    logpt = jnp.take_along_axis(logp, targets.reshape(-1, 1).clip(0), axis=1)[:, 0]
    pt = jnp.exp(logpt)
    focal = -1.0 * (1.0 - pt) ** GAMMA * logpt
    weights = jnp.where(targets > 0, 1.0 - ALPHA, ALPHA)
    tmp = focal * weights * valid
    return jnp.sum(tmp) / jnp.sum(valid.astype(jnp.float32))


if __name__ == "__main__":
    key = jax.random.PRNGKey(0)
    k1, k2 = jax.random.split(key)

    # Ragged N on purpose (19 % 8 != 0) to exercise the unpadded tail block.
    N, C = 19, 32
    logits = jax.random.normal(k1, (N, C), dtype=jnp.float32)
    targets = jax.random.randint(k2, (N,), 0, C, dtype=jnp.int32)
    # exercise ignore_index masking on one row
    targets = targets.at[3].set(IGNORE_INDEX)

    loss = focal_loss(logits, targets)
    jax.block_until_ready(loss)

    ref = focal_loss_ref(logits, targets)
    assert jnp.allclose(loss, ref, rtol=1e-5, atol=1e-6), (loss, ref)

    print("KERNEL_OK")
</pallas_src>

<mosaic_0001>
module attributes {stable_mosaic.version = 11 : i64} {
  func.func @kernel(%arg0: i32, %arg1: memref<8x32xf32, #tpu.memory_space<vmem>>, %arg2: memref<8x1xi32, #tpu.memory_space<vmem>>, %arg3: memref<1x1x2xf32, #tpu.memory_space<vmem>>) attributes {dimension_semantics = [#tpu.dimension_semantics<parallel>], iteration_bounds = array<i64: 3>, scalar_prefetch = 0 : i64, scratch_operands = 0 : i64, tpu.core_type = #tpu.core_type<tc>, window_params = [{transform_indices = @transform_0, window_bounds = array<i64: 8, 32>}, {transform_indices = @transform_1, window_bounds = array<i64: 8, 1>}, {transform_indices = @transform_2, window_bounds = array<i64: 1, 1, 2>}]} {
    %c0 = arith.constant 0 : index
    %c0_0 = arith.constant 0 : index
    %0 = vector.load %arg1[%c0, %c0_0] : memref<8x32xf32, #tpu.memory_space<vmem>>, vector<8x32xf32>
    %c0_1 = arith.constant 0 : index
    %c0_2 = arith.constant 0 : index
    %1 = vector.load %arg2[%c0_1, %c0_2] : memref<8x1xi32, #tpu.memory_space<vmem>>, vector<8x1xi32>
    %c8_i32 = arith.constant 8 : i32
    %2 = arith.muli %arg0, %c8_i32 : i32
    %3 = tpu.iota {dimensions = array<i32: 0>} : vector<8x1xi32>
    %4 = vector.broadcast %2 : i32 to vector<8x1xi32>
    %5 = arith.addi %4, %3 : vector<8x1xi32>
    %c19_i32 = arith.constant 19 : i32
    %6 = vector.broadcast %c19_i32 : i32 to vector<8x1xi32>
    %7 = arith.cmpi slt, %5, %6 : vector<8x1xi32>
    %c-100_i32 = arith.constant -100 : i32
    %8 = vector.broadcast %c-100_i32 : i32 to vector<8x1xi32>
    %9 = arith.cmpi ne, %1, %8 : vector<8x1xi32>
    %10 = arith.andi %7, %9 : vector<8x1xi1>
    %cst = arith.constant dense<0xFF800000> : vector<8xf32>
    %11 = vector.multi_reduction <maximumf>, %0, %cst [1] : vector<8x32xf32> to vector<8xf32>
    %12 = vector.shape_cast %11 : vector<8xf32> to vector<8x1xf32>
    %13 = vector.broadcast %12 : vector<8x1xf32> to vector<8x32xf32>
    %14 = arith.subf %0, %13 : vector<8x32xf32>
    %15 = math.exp %14 : vector<8x32xf32>
    %cst_3 = arith.constant dense<0.000000e+00> : vector<8xf32>
    %16 = vector.multi_reduction <add>, %15, %cst_3 [1] : vector<8x32xf32> to vector<8xf32>
    %17 = vector.shape_cast %16 : vector<8xf32> to vector<8x1xf32>
    %18 = math.log %17 : vector<8x1xf32>
    %19 = tpu.iota {dimensions = array<i32: 1>} : vector<8x32xi32>
    %20 = vector.broadcast %1 : vector<8x1xi32> to vector<8x32xi32>
    %21 = arith.cmpi eq, %19, %20 : vector<8x32xi32>
    %cst_4 = arith.constant 0.000000e+00 : f32
    %22 = vector.broadcast %cst_4 : f32 to vector<8x32xf32>
    %23 = arith.select %21, %0, %22 : vector<8x32xi1>, vector<8x32xf32>
    %cst_5 = arith.constant dense<0.000000e+00> : vector<8xf32>
    %24 = vector.multi_reduction <add>, %23, %cst_5 [1] : vector<8x32xf32> to vector<8xf32>
    %25 = vector.shape_cast %24 : vector<8xf32> to vector<8x1xf32>
    %26 = arith.subf %25, %12 : vector<8x1xf32>
    %27 = arith.subf %26, %18 : vector<8x1xf32>
    %28 = math.exp %27 : vector<8x1xf32>
    %cst_6 = arith.constant 1.000000e+00 : f32
    %29 = vector.broadcast %cst_6 : f32 to vector<8x1xf32>
    %30 = arith.subf %29, %28 : vector<8x1xf32>
    %31 = arith.mulf %30, %30 : vector<8x1xf32>
    %cst_7 = arith.constant 0.000000e+00 : f32
    %32 = vector.broadcast %cst_7 : f32 to vector<8x1xf32>
    %33 = arith.subf %32, %31 : vector<8x1xf32>
    %34 = arith.mulf %33, %27 : vector<8x1xf32>
    %c0_i32 = arith.constant 0 : i32
    %35 = vector.broadcast %c0_i32 : i32 to vector<8x1xi32>
    %36 = arith.cmpi sgt, %1, %35 : vector<8x1xi32>
    %cst_8 = arith.constant 5.000000e-01 : f32
    %cst_9 = arith.constant 5.000000e-01 : f32
    %37 = vector.broadcast %cst_8 : f32 to vector<8x1xf32>
    %38 = vector.broadcast %cst_9 : f32 to vector<8x1xf32>
    %39 = arith.select %36, %37, %38 : vector<8x1xi1>, vector<8x1xf32>
    %40 = arith.mulf %34, %39 : vector<8x1xf32>
    %cst_10 = arith.constant 0.000000e+00 : f32
    %41 = vector.broadcast %cst_10 : f32 to vector<8x1xf32>
    %42 = arith.select %10, %40, %41 : vector<8x1xi1>, vector<8x1xf32>
    %43 = arith.extui %10 : vector<8x1xi1> to vector<8x1xi32>
    %44 = arith.sitofp %43 : vector<8x1xi32> to vector<8x1xf32>
    %45 = vector.shape_cast %42 : vector<8x1xf32> to vector<1x8x1xf32>
    %cst_11 = arith.constant dense<0.000000e+00> : vector<1xf32>
    %46 = vector.multi_reduction <add>, %45, %cst_11 [1, 2] : vector<1x8x1xf32> to vector<1xf32>
    %47 = vector.shape_cast %46 : vector<1xf32> to vector<1x1x1xf32>
    %48 = vector.extract %47[0, 0, 0] : f32 from vector<1x1x1xf32>
    %49 = vector.shape_cast %44 : vector<8x1xf32> to vector<1x8x1xf32>
    %cst_12 = arith.constant dense<0.000000e+00> : vector<1xf32>
    %50 = vector.multi_reduction <add>, %49, %cst_12 [1, 2] : vector<1x8x1xf32> to vector<1xf32>
    %51 = vector.shape_cast %50 : vector<1xf32> to vector<1x1x1xf32>
    %52 = vector.extract %51[0, 0, 0] : f32 from vector<1x1x1xf32>
    %53 = tpu.iota {dimensions = array<i32: 2>} : vector<1x1x2xi32>
    %c0_i32_13 = arith.constant 0 : i32
    %54 = vector.broadcast %c0_i32_13 : i32 to vector<1x1x2xi32>
    %55 = arith.cmpi eq, %53, %54 : vector<1x1x2xi32>
    %56 = vector.broadcast %48 : f32 to vector<1x1x2xf32>
    %57 = vector.broadcast %52 : f32 to vector<1x1x2xf32>
    %58 = arith.select %55, %56, %57 : vector<1x1x2xi1>, vector<1x1x2xf32>
    %c0_14 = arith.constant 0 : index
    %c0_15 = arith.constant 0 : index
    %c0_16 = arith.constant 0 : index
    %59 = vector.load %arg3[%c0_14, %c0_15, %c0_16] : memref<1x1x2xf32, #tpu.memory_space<vmem>>, vector<1x1x2xf32>
    tpu.vector_store %arg3[%c0_14, %c0_15, %c0_16], %58 {strides = array<i32>} : memref<1x1x2xf32, #tpu.memory_space<vmem>>, vector<1x1x2xf32>,
    return
  }
  func.func @transform_0(%arg0: i32) -> (i32, i32) {
    %c0_i32 = arith.constant 0 : i32
    %c0_i32_0 = arith.constant 0 : i32
    return %arg0, %c0_i32 : i32, i32
  }
  func.func @transform_1(%arg0: i32) -> (i32, i32) {
    %c0_i32 = arith.constant 0 : i32
    %c0_i32_0 = arith.constant 0 : i32
    return %arg0, %c0_i32 : i32, i32
  }
  func.func @transform_2(%arg0: i32) -> (i32, i32, i32) {
    %c0_i32 = arith.constant 0 : i32
    %c0_i32_0 = arith.constant 0 : i32
    %c0_i32_1 = arith.constant 0 : i32
    return %arg0, %c0_i32, %c0_i32_0 : i32, i32, i32
  }
}

</mosaic_0001>

<bundles_post_ra>
// kernel: tpu_custom_call.1
= control target key start
LH: loop header
LB: loop body
LE: loop exit
PB: predicated region body
PF: predicated region fallthrough
CT: control target
= control target key end

     0   :  { %s341_s9 = smov 0   ;;  %s377_s0 = inlined_call_operand.vmem [shape: f32[19,32], index: 0, kind: input, shape index: {}]   ;;  %s378_s1 = inlined_call_operand.vmem [shape: s32[19,1], index: 1, kind: input, shape index: {}]   ;;  %s379_s2 = inlined_call_operand.vmem [shape: f32[3,1,2], index: 2, kind: output, shape index: {}]  }
   0x1 LB: > { %s347_s10 = sadd.s32 4294967295, %s322_s9   ;;  %p288_p0 = scmp.ge.s32.totalorder %s322_s9, 1  ;;  %s322_s9 = sphi %s341_s9, %s12_s9  }
   0x2   : > { %p120_p1 = scmp.lt.s32.totalorder %s322_s9, 4 }
   0x4   : > { %p121_p2 = pnand %p288_p0, %p120_p1 }
   0x5   : > { %p143_p3 = scmp.lt.s32.totalorder (!%p121_p2), %s347_s10, 2  ;;  %s291_s19 = sshll.u32 (!%p121_p2), %s347_s10, 3 }
   0x6   : > { %124 = sbr.rel (%p121_p2) target bundleno = 565 (0x235), region = 28 }
   0xb   : > { %v324_v0 = vmov 0   ;;  %s353_s11 = scalar_select %p143_p3, %s347_s10, 2  ;;  %vm164_vm0 = vcmask 261120   ;;  %v157_v7 = vlaneseq  ;;  %v159_v22 = vstv %s291_s19 }
   0xc   : > { %309 = vset.pattern.permute.xlu0 %v324_v0  ;;  %vm198_vm5 = vcmask 7168   ;;  %v325_v31 = vmov 0.0   ;;  %vm223_vm7 = vcmask 8192  }
   0xd   : > { %s289_s12 = sshll.u32 %s353_s11, 3  ;;  %v363_v8 = vand.u32 127, %v157_v7  ;;  %v158_v21 = vshrl.u32 %v157_v7, 7  ;;  %s153_s23 = scalar_lea.vmem %s379_s2, %s353_s11 }
   0xe   : > { %s146_s15 = scalar_lea.vmem %s377_s0, %s289_s12  ;;  %s150_s18 = scalar_lea.vmem %s378_s1, %s289_s12 }
   0xf   : > { %v154_v1 = vld [vmem:[%s146_s15] sm:$0xff]  ;;  %v160_v24 = vadd.s32 %v159_v22, %v158_v21  ;;  %vm219_vm6 = vcmp.eq.s32.totalorder %v363_v8, 0 }
  0x10   : > { %v165_v2 = vsel %vm164_vm0, %v154_v1, -inf  ;;  %v155_v3 = vld [vmem:[%s150_s18] sm:$0xff] }
  0x11   : > { %166 = vmax.xlane.f32.xlu0 %v165_v2  ;;  %vm162_vm2 = vcmp.ne.s32.totalorder %v155_v3, 4294967196  ;;  %vm161_vm3 = vcmp.lt.s32.totalorder %v160_v24, 19 }
  0x12   : > { %vm163_vm4 = vmand %vm161_vm3, %vm162_vm2 }
  0x13   : > { %v292_v32 = vsel %vm163_vm4, 1.0, %v325_v31 }
  0x14   : > { %v209_v34 = vsel %vm198_vm5, %v292_v32, 0.0 }
  0x27   : > { %179 = vperm.xlu0 %309, %v155_v3  }
  0x9a   : > { %v167_v4 = vpop.xlane.xlu0 %166 }
  0x9b   : > { %v168_v5 = vsub.f32 %v154_v1, %v167_v4 }
  0x9d   : > { %v169_v6 = vmul.f32 1.442695, %v168_v5 }
  0x9f   : > { %310 = vpow2.f32 %v169_v6 }
  0xa2   : > { %v180_v9 = vpop.permute.xlu0 %179 }
  0xa3   : > { %vm181_vm1 = vcmp.eq.s32.totalorder %v363_v8, %v180_v9 }
  0xa4   : > { %v182_v11 = vsel %vm181_vm1, %v154_v1, 0.0 }
  0xa5   : > { %v183_v13 = vsel %vm164_vm0, %v182_v11, 0.0 }
  0xac   : > { %v311_v10 = vpop.eup %310 }
  0xad   : > { %v171_v12 = vsel %vm164_vm0, %v311_v10, 0.0 }
  0xae   : > { %172 = vadd.xlane.f32.xlu1 %v171_v12 }
  0xb2   : > { %184 = vadd.xlane.f32.xlu1 %v183_v13 }
 0x137   : > { %v173_v14 = vpop.xlane.xlu1 %172 }
 0x138   : > { %312 = vlog2.f32 %v173_v14 }
 0x13b   : > { %v185_v15 = vpop.xlane.xlu1 %184 }
 0x13c   : > { %v186_v18 = vsub.f32 %v185_v15, %v167_v4 }
 0x145   : > { %v313_v16 = vpop.eup %312 }
 0x146   : > { %v175_v17 = vmul.f32 0.6931472, %v313_v16 }
 0x148   : > { %v187_v19 = vsub.f32 %v186_v18, %v175_v17 }
 0x14a   : > { %v188_v20 = vmul.f32 1.442695, %v187_v19 }
 0x14c   : > { %314 = vpow2.f32 %v188_v20 }
 0x159   : > { %v315_v23 = vpop.eup %314 }
 0x15a   : > { %v190_v25 = vsub.f32 1.0, %v315_v23 }
 0x15c   : > { %v191_v26 = vmul.f32 %v190_v25, %v190_v25 }
 0x15e   : > { %v192_v27 = vsub.f32 0.0, %v191_v26 }
 0x160   : > { %v193_v28 = vmul.f32 %v192_v27, %v187_v19 }
 0x162   : > { %v194_v29 = vmul.f32 0.5, %v193_v28 }
 0x164   : > { %v195_v30 = vsel %vm163_vm4, %v194_v29, 0.0 }
 0x165   : > { %v199_v33 = vsel %vm198_vm5, %v195_v30, 0.0 }
 0x166   : > { %200 = vadd.xlane.f32.xlu1 %v199_v33 }
 0x16a   : > { %210 = vadd.xlane.f32.xlu1 %v209_v34 }
 0x1ef   : > { %v201_v35 = vpop.xlane.xlu1 %200 }
 0x1f0   : > { %v202_v36 = vrot.slane %v201_v35, 4 }
 0x1f2   : > { %v203_v37 = vadd.f32 %v202_v36, %v201_v35 }
 0x1f3   : > { %v211_v38 = vpop.xlane.xlu1 %210 }
 0x1f4   : > { %v204_v39 = vrot.slane %v203_v37, 2  ;;  %v212_v40 = vrot.slane %v211_v38, 4 }
 0x1f6   : > { %v213_v41 = vadd.f32 %v212_v40, %v211_v38  ;;  %v205_v42 = vadd.f32 %v204_v39, %v203_v37 }
 0x1f8   : > { %v214_v43 = vrot.slane %v213_v41, 2  ;;  %v206_v44 = vrot.slane %v205_v42, 1 }
 0x1fa   : > { %v215_v45 = vadd.f32 %v214_v43, %v213_v41  ;;  %v207_v46 = vadd.f32 %v206_v44, %v205_v42 }
 0x1fc   : > { %295 = vpush %v207_v46  ;;  %v216_v47 = vrot.slane %v215_v45, 1 }
 0x1fe   : > { %v217_v48 = vadd.f32 %v216_v47, %v215_v45 }
 0x200   : > { %297 = vpush %v217_v48 }
 0x22d   : > { %s296_s20 = spop %295 }
 0x22e   : > { %v220_v49 = vstv %s296_s20 }
 0x231   : > { %s298_s24 = spop %297 }
 0x232   : > { %v221_v50 = vstv %s298_s24 }
 0x233   : > { %v222_v51 = vsel %vm219_vm6, %v220_v49, %v221_v50 }
 0x234   : > { %224 = vst.msk [vmem:[%s153_s23] sm:$0x1] %vm223_vm7, %v222_v51 }
 0x235 PF: > { %s12_s9 = sadd.s32 1, %s322_s9  }
 0x236   : > { %p9_p4 = scmp.ge.s32.totalorder %s12_s9, 5  }
 0x238   :  { %11 = sbr.rel (!%p9_p4) target bundleno = 1 (0x1), region = 61 }

</bundles_post_ra>
